<compile_context>
chip_gen: v6e
topology: v6e:2x2x1
jax: 0.10.0
libtpu: 0.0.40
codegen_flags: <defaults>
</compile_context>

<pallas_src>
import jax
import jax.numpy as jnp
from jax.experimental import pallas as pl
from jax.experimental.pallas import tpu as pltpu

EPS = 1e-5


# ------------------------------- kernel ------------------------------------ #

def _bottleneck_kernel(x_ref, a1_ref, b1_ref, a2_ref, b3_ref, a3_ref, b4_ref,
                       asc_ref, o_ref, zp_ref):
    """Whole bottleneck block for one image; activations resident in VMEM.

      x_ref   : (1, H, W*Cin)   f32   input rows (NHWC rows flattened)
      a1_ref  : (W*Cin, W*P)    bf16  conv1(1x1) with bn1/bn2 folded (block-diagonal)
      b1_ref  : (1, W*P)        f32   folded stage-1 bias
      a2_ref  : (3, W*P, W*P)   bf16  conv2(3x3): one banded matrix per vertical tap dh
      b3_ref  : (1, W*P)        f32   folded stage-2 bias (= bn3 shift)
      a3_ref  : (W*P, W*Cout)   bf16  conv3(1x1) with bn4 + ShakeDrop(eval) folded
      b4_ref  : (1, W*Cout)     f32   folded stage-3 bias
      asc_ref : (W*Cin, W*Cout) f32   0/1 channel-zero-pad embedding for the shortcut
      o_ref   : (1, H, W*Cout)  f32   output rows (lane dim = W*Cout, multiple of 128)
      zp_ref  : (H+16, W*P)     f32   VMEM scratch: stage-1 output with 8-row halos
    """
    H = x_ref.shape[1]
    WP = zp_ref.shape[1]

    x = x_ref[0]                                    # (H, W*Cin) f32
    xb = x.astype(jnp.bfloat16)

    # ---- vertical halo rows (zeros) in VMEM; sublane-aligned 8-row stores ----
    zero8 = jnp.zeros((8, WP), jnp.float32)
    zp_ref[0:8, :] = zero8                          # top halo (row 7 == y = -1)
    zp_ref[H + 8:H + 16, :] = zero8                 # bottom halo (row H+8 == y = H)

    # ---- stage 1: bn1 -> conv1(1x1) -> bn2 -> relu (all folded into A1/b1) ----
    z = jnp.dot(xb, a1_ref[...], preferred_element_type=jnp.float32)
    z = jnp.maximum(z + b1_ref[...], 0.0)           # (H, W*P) f32
    zp_ref[8:8 + H, :] = z                          # interior, sublane-aligned store

    # ---- stage 2: conv2(3x3, pad=1) -> bn3 -> relu ----------------------------
    # One matmul per vertical tap dh; the horizontal taps (dw) are the bands of
    # A2[dh], so SAME padding along W is implicit and there is no per-tap
    # slice/reshape/copy of the activation.  Seed the accumulator with the
    # aligned center tap (dh=1).
    acc = jnp.dot(zp_ref[8:8 + H, :].astype(jnp.bfloat16), a2_ref[1],
                  preferred_element_type=jnp.float32)
    for dh in (0, 2):
        slab = zp_ref[7 + dh:7 + dh + H, :].astype(jnp.bfloat16)      # (H, W*P)
        acc = acc + jnp.dot(slab, a2_ref[dh], preferred_element_type=jnp.float32)
    v = jnp.maximum(acc + b3_ref[...], 0.0)         # (H, W*P) f32

    # ---- stage 3: conv3(1x1) -> bn4 -> ShakeDrop(eval) (folded into A3/b4) ----
    r = jnp.dot(v.astype(jnp.bfloat16), a3_ref[...],
                preferred_element_type=jnp.float32) + b4_ref[...]     # (H, W*Cout)

    # ---- shortcut: channel-zero-padded identity, exact in f32 -----------------
    sc = jnp.dot(x, asc_ref[...], preferred_element_type=jnp.float32)
    o_ref[0] = r + sc


# ------------------------------- wrapper ----------------------------------- #

def _fold_bn(bn):
    """Fold eval-mode BN into per-channel scale/shift."""
    gamma, beta, mean, var = bn
    s = gamma * jax.lax.rsqrt(var + EPS)
    return s, beta - mean * s


def _build_fused_weights(params, W, p_shakedrop):
    """Fold BN / ShakeDrop into the convs and lift them to the row layout."""
    s1, t1 = _fold_bn(params["bn1"])
    s2, t2 = _fold_bn(params["bn2"])
    s3, t3 = _fold_bn(params["bn3"])
    s4, t4 = _fold_bn(params["bn4"])
    w1, w2, w3 = params["w1"], params["w2"], params["w3"]
    Cin, P = w1.shape
    Cout = w3.shape[1]
    keep = 1.0 - p_shakedrop

    # Per-channel conv weights with BN (and the ShakeDrop eval scale) folded in.
    w1f = (s1[:, None] * w1) * s2[None, :]                          # (Cin, P)
    b1f = (t1 @ w1) * s2 + t2                                       # (P,)
    w2f = w2 * s3[None, None, None, :]                              # (3,3,P,P) HWIO
    b3f = t3                                                        # (P,)
    w3f = w3 * (keep * s4)[None, :]                                 # (P, Cout)
    b4f = keep * t4                                                 # (Cout,)

    # Lift to the row layout: 1x1 convs -> block-diagonal matrices; the 3x3 conv
    # -> one banded matrix per vertical tap dh (dw taps are the off-diagonals).
    eye_w = jnp.eye(W, dtype=jnp.float32)
    A1 = jnp.kron(eye_w, w1f)                                       # (W*Cin, W*P)
    A3 = jnp.kron(eye_w, w3f)                                       # (W*P, W*Cout)
    Asc = jnp.kron(eye_w, jnp.eye(Cin, Cout, dtype=jnp.float32))    # (W*Cin, W*Cout)
    A2 = jnp.stack([
        sum(jnp.kron(jnp.eye(W, k=1 - dw, dtype=jnp.float32), w2f[dh, dw])
            for dw in range(3))
        for dh in range(3)
    ])                                                              # (3, W*P, W*P)

    b1r = jnp.tile(b1f, W)[None, :]                                 # (1, W*P)
    b3r = jnp.tile(b3f, W)[None, :]                                 # (1, W*P)
    b4r = jnp.tile(b4f, W)[None, :]                                 # (1, W*Cout)

    return (A1.astype(jnp.bfloat16), b1r, A2.astype(jnp.bfloat16), b3r,
            A3.astype(jnp.bfloat16), b4r, Asc)


def bottleneck_forward(x_nchw, params, *, p_shakedrop=0.5):
    N, Cin, H, W = x_nchw.shape
    P = params["w1"].shape[1]
    Cout = params["w3"].shape[1]
    WCin, WP, WCout = W * Cin, W * P, W * Cout

    # NCHW -> per-row flattened NHWC ("row layout"); small one-time relayout.
    x_row = jnp.transpose(x_nchw.astype(jnp.float32), (0, 2, 3, 1)).reshape(N, H, WCin)

    A1, b1r, A2, b3r, A3, b4r, Asc = _build_fused_weights(params, W, p_shakedrop)

    flops = 2 * N * H * (WCin * WP + 3 * WP * WP + WP * WCout + WCin * WCout)
    bytes_accessed = int(x_row.size * 4 + N * H * WCout * 4
                         + A1.size * 2 + A2.size * 2 + A3.size * 2 + Asc.size * 4
                         + (b1r.size + b3r.size + b4r.size) * 4)

    out_row = pl.pallas_call(
        _bottleneck_kernel,
        out_shape=jax.ShapeDtypeStruct((N, H, WCout), jnp.float32),
        grid=(N,),
        in_specs=[
            pl.BlockSpec((1, H, WCin), lambda n: (n, 0, 0)),     # x rows
            pl.BlockSpec((WCin, WP), lambda n: (0, 0)),          # A1
            pl.BlockSpec((1, WP), lambda n: (0, 0)),             # b1
            pl.BlockSpec((3, WP, WP), lambda n: (0, 0, 0)),      # A2 (per-dh bands)
            pl.BlockSpec((1, WP), lambda n: (0, 0)),             # b3
            pl.BlockSpec((WP, WCout), lambda n: (0, 0)),         # A3
            pl.BlockSpec((1, WCout), lambda n: (0, 0)),          # b4
            pl.BlockSpec((WCin, WCout), lambda n: (0, 0)),       # shortcut embed
        ],
        out_specs=pl.BlockSpec((1, H, WCout), lambda n: (n, 0, 0)),
        scratch_shapes=[pltpu.VMEM((H + 16, WP), jnp.float32)],
        compiler_params=pltpu.CompilerParams(
            dimension_semantics=("parallel",),
            vmem_limit_bytes=32 * 1024 * 1024),
        cost_estimate=pl.CostEstimate(flops=flops, transcendentals=0,
                                      bytes_accessed=bytes_accessed),
    )(x_row, A1, b1r, A2, b3r, A3, b4r, Asc)

    return jnp.transpose(out_row.reshape(N, H, W, Cout), (0, 3, 1, 2))  # -> NCHW


# ------------------------ parameters & reference ---------------------------- #

def init_params(key, inplanes, planes):
    out_ch = planes * 4  # Bottleneck.outchannel_ratio = 4
    ks = jax.random.split(key, 7)

    def bn_params(k, c):
        k1, k2, k3, k4 = jax.random.split(k, 4)
        gamma = 1.0 + 0.1 * jax.random.normal(k1, (c,), jnp.float32)
        beta = 0.1 * jax.random.normal(k2, (c,), jnp.float32)
        mean = 0.1 * jax.random.normal(k3, (c,), jnp.float32)
        var = jax.random.uniform(k4, (c,), jnp.float32, 0.5, 1.5)
        return gamma, beta, mean, var

    return {
        "bn1": bn_params(ks[0], inplanes),
        "w1": 0.2 * jax.random.normal(ks[1], (inplanes, planes), jnp.float32),
        "bn2": bn_params(ks[2], planes),
        "w2": 0.2 * jax.random.normal(ks[3], (3, 3, planes, planes), jnp.float32),
        "bn3": bn_params(ks[4], planes),
        "w3": 0.2 * jax.random.normal(ks[5], (planes, out_ch), jnp.float32),
        "bn4": bn_params(ks[6], out_ch),
    }


def reference_forward(x_nchw, params, *, p_shakedrop=0.5):
    """Pure-JAX reference (eval mode), NCHW in / NCHW out."""
    x = jnp.transpose(x_nchw, (0, 2, 3, 1)).astype(jnp.float32)

    def bn(h, p):
        g, b, m, v = p
        return (h - m) / jnp.sqrt(v + EPS) * g + b

    h = bn(x, params["bn1"])
    h = jnp.einsum("nhwc,co->nhwo", h, params["w1"])
    h = jax.nn.relu(bn(h, params["bn2"]))
    h = jax.lax.conv_general_dilated(
        h, params["w2"], window_strides=(1, 1), padding="SAME",
        dimension_numbers=("NHWC", "HWIO", "NHWC"))
    h = jax.nn.relu(bn(h, params["bn3"]))
    h = jnp.einsum("nhwc,co->nhwo", h, params["w3"])
    h = bn(h, params["bn4"]) * (1.0 - p_shakedrop)
    cin, cout = x.shape[-1], h.shape[-1]
    sc = jnp.pad(x, ((0, 0), (0, 0), (0, 0), (0, cout - cin))) if cout != cin else x
    return jnp.transpose(h + sc, (0, 3, 1, 2))


# ---------------------------------- main ------------------------------------ #

if __name__ == "__main__":
    key = jax.random.PRNGKey(0)
    k_x, k_p = jax.random.split(key)

    N, Cin, H, W = 2, 4, 16, 16
    planes = 4
    p_shakedrop = 0.5

    x = jax.random.normal(k_x, (N, Cin, H, W), jnp.float32)
    params = init_params(k_p, Cin, planes)

    out = jax.block_until_ready(bottleneck_forward(x, params, p_shakedrop=p_shakedrop))
    ref = reference_forward(x, params, p_shakedrop=p_shakedrop)

    assert out.shape == (N, planes * 4, H, W), out.shape
    max_err = float(jnp.max(jnp.abs(out - ref)))
    # Residual path runs through bf16 MXU operands (f32 accumulation); the identity
    # shortcut stays exact f32, so a 2e-2 absolute tolerance is comfortably loose
    # for bf16 yet far below any real structural/numerical bug.
    assert max_err < 2e-2, f"max abs error vs reference: {max_err}"

    print("KERNEL_OK")
</pallas_src>

<mosaic_0001>
module attributes {stable_mosaic.version = 11 : i64} {
  func.func @_bottleneck_kernel(%arg0: i32, %arg1: memref<1x16x64xf32, #tpu.memory_space<vmem>>, %arg2: memref<64x64xbf16, #tpu.memory_space<vmem>>, %arg3: memref<1x64xf32, #tpu.memory_space<vmem>>, %arg4: memref<3x64x64xbf16, #tpu.memory_space<vmem>>, %arg5: memref<1x64xf32, #tpu.memory_space<vmem>>, %arg6: memref<64x256xbf16, #tpu.memory_space<vmem>>, %arg7: memref<1x256xf32, #tpu.memory_space<vmem>>, %arg8: memref<64x256xf32, #tpu.memory_space<vmem>>, %arg9: memref<1x16x256xf32, #tpu.memory_space<vmem>>, %arg10: memref<32x64xf32, #tpu.memory_space<vmem>>) attributes {dimension_semantics = [#tpu.dimension_semantics<parallel>], iteration_bounds = array<i64: 2>, scalar_prefetch = 0 : i64, scratch_operands = 1 : i64, tpu.core_type = #tpu.core_type<tc>, window_params = [{transform_indices = @transform_0, window_bounds = array<i64: 1, 16, 64>}, {pipeline_mode = #tpu.pipeline_mode<synchronous>, transform_indices = @transform_1, window_bounds = array<i64: 64, 64>}, {pipeline_mode = #tpu.pipeline_mode<synchronous>, transform_indices = @transform_2, window_bounds = array<i64: 1, 64>}, {pipeline_mode = #tpu.pipeline_mode<synchronous>, transform_indices = @transform_3, window_bounds = array<i64: 3, 64, 64>}, {pipeline_mode = #tpu.pipeline_mode<synchronous>, transform_indices = @transform_4, window_bounds = array<i64: 1, 64>}, {pipeline_mode = #tpu.pipeline_mode<synchronous>, transform_indices = @transform_5, window_bounds = array<i64: 64, 256>}, {pipeline_mode = #tpu.pipeline_mode<synchronous>, transform_indices = @transform_6, window_bounds = array<i64: 1, 256>}, {pipeline_mode = #tpu.pipeline_mode<synchronous>, transform_indices = @transform_7, window_bounds = array<i64: 64, 256>}, {transform_indices = @transform_8, window_bounds = array<i64: 1, 16, 256>}]} {
    %c0 = arith.constant 0 : index
    %c0_0 = arith.constant 0 : index
    %c0_1 = arith.constant 0 : index
    %0 = vector.load %arg1[%c0, %c0_0, %c0_1] : memref<1x16x64xf32, #tpu.memory_space<vmem>>, vector<1x16x64xf32>
    %1 = vector.shape_cast %0 : vector<1x16x64xf32> to vector<16x64xf32>
    %2 = arith.truncf %1 : vector<16x64xf32> to vector<16x64xbf16>
    %cst = arith.constant 0.000000e+00 : f32
    %3 = vector.broadcast %cst : f32 to vector<8x64xf32>
    %c0_2 = arith.constant 0 : index
    %c0_3 = arith.constant 0 : index
    %4 = vector.load %arg10[%c0_2, %c0_3] : memref<32x64xf32, #tpu.memory_space<vmem>>, vector<8x64xf32>
    tpu.vector_store %arg10[%c0_2, %c0_3], %3 {strides = array<i32>} : memref<32x64xf32, #tpu.memory_space<vmem>>, vector<8x64xf32>,
    %c24 = arith.constant 24 : index
    %c0_4 = arith.constant 0 : index
    %5 = vector.load %arg10[%c24, %c0_4] : memref<32x64xf32, #tpu.memory_space<vmem>>, vector<8x64xf32>
    tpu.vector_store %arg10[%c24, %c0_4], %3 {strides = array<i32>} : memref<32x64xf32, #tpu.memory_space<vmem>>, vector<8x64xf32>,
    %c0_5 = arith.constant 0 : index
    %c0_6 = arith.constant 0 : index
    %6 = vector.load %arg2[%c0_5, %c0_6] : memref<64x64xbf16, #tpu.memory_space<vmem>>, vector<64x64xbf16>
    %cst_7 = arith.constant dense<0.000000e+00> : vector<16x64xf32>
    %7 = tpu.matmul %2, %6, %cst_7 {dimension_numbers = #tpu.dot_dimension_numbers<[1], [0], [0], [1], [0, 0, 1, 1], [], []>} : vector<16x64xbf16>, vector<64x64xbf16>, vector<16x64xf32> -> vector<16x64xf32>
    %c0_8 = arith.constant 0 : index
    %c0_9 = arith.constant 0 : index
    %8 = vector.load %arg3[%c0_8, %c0_9] : memref<1x64xf32, #tpu.memory_space<vmem>>, vector<1x64xf32>
    %9 = vector.broadcast %8 : vector<1x64xf32> to vector<16x64xf32>
    %10 = arith.addf %7, %9 : vector<16x64xf32>
    %cst_10 = arith.constant 0.000000e+00 : f32
    %11 = vector.broadcast %cst_10 : f32 to vector<16x64xf32>
    %12 = arith.maximumf %10, %11 : vector<16x64xf32>
    %c8 = arith.constant 8 : index
    %c0_11 = arith.constant 0 : index
    %13 = vector.load %arg10[%c8, %c0_11] : memref<32x64xf32, #tpu.memory_space<vmem>>, vector<16x64xf32>
    tpu.vector_store %arg10[%c8, %c0_11], %12 {strides = array<i32>} : memref<32x64xf32, #tpu.memory_space<vmem>>, vector<16x64xf32>,
    %c8_12 = arith.constant 8 : index
    %c0_13 = arith.constant 0 : index
    %14 = vector.load %arg10[%c8_12, %c0_13] : memref<32x64xf32, #tpu.memory_space<vmem>>, vector<16x64xf32>
    %15 = arith.truncf %14 : vector<16x64xf32> to vector<16x64xbf16>
    %c1 = arith.constant 1 : index
    %c0_14 = arith.constant 0 : index
    %c0_15 = arith.constant 0 : index
    %16 = vector.load %arg4[%c1, %c0_14, %c0_15] : memref<3x64x64xbf16, #tpu.memory_space<vmem>>, vector<1x64x64xbf16>
    %17 = vector.shape_cast %16 : vector<1x64x64xbf16> to vector<64x64xbf16>
    %cst_16 = arith.constant dense<0.000000e+00> : vector<16x64xf32>
    %18 = tpu.matmul %15, %17, %cst_16 {dimension_numbers = #tpu.dot_dimension_numbers<[1], [0], [0], [1], [0, 0, 1, 1], [], []>} : vector<16x64xbf16>, vector<64x64xbf16>, vector<16x64xf32> -> vector<16x64xf32>
    %c7 = arith.constant 7 : index
    %c0_17 = arith.constant 0 : index
    %19 = vector.load %arg10[%c7, %c0_17] : memref<32x64xf32, #tpu.memory_space<vmem>>, vector<16x64xf32>
    %20 = arith.truncf %19 : vector<16x64xf32> to vector<16x64xbf16>
    %c0_18 = arith.constant 0 : index
    %c0_19 = arith.constant 0 : index
    %c0_20 = arith.constant 0 : index
    %21 = vector.load %arg4[%c0_18, %c0_19, %c0_20] : memref<3x64x64xbf16, #tpu.memory_space<vmem>>, vector<1x64x64xbf16>
    %22 = vector.shape_cast %21 : vector<1x64x64xbf16> to vector<64x64xbf16>
    %cst_21 = arith.constant dense<0.000000e+00> : vector<16x64xf32>
    %23 = tpu.matmul %20, %22, %cst_21 {dimension_numbers = #tpu.dot_dimension_numbers<[1], [0], [0], [1], [0, 0, 1, 1], [], []>} : vector<16x64xbf16>, vector<64x64xbf16>, vector<16x64xf32> -> vector<16x64xf32>
    %24 = arith.addf %18, %23 : vector<16x64xf32>
    %c9 = arith.constant 9 : index
    %c0_22 = arith.constant 0 : index
    %25 = vector.load %arg10[%c9, %c0_22] : memref<32x64xf32, #tpu.memory_space<vmem>>, vector<16x64xf32>
    %26 = arith.truncf %25 : vector<16x64xf32> to vector<16x64xbf16>
    %c2 = arith.constant 2 : index
    %c0_23 = arith.constant 0 : index
    %c0_24 = arith.constant 0 : index
    %27 = vector.load %arg4[%c2, %c0_23, %c0_24] : memref<3x64x64xbf16, #tpu.memory_space<vmem>>, vector<1x64x64xbf16>
    %28 = vector.shape_cast %27 : vector<1x64x64xbf16> to vector<64x64xbf16>
    %cst_25 = arith.constant dense<0.000000e+00> : vector<16x64xf32>
    %29 = tpu.matmul %26, %28, %cst_25 {dimension_numbers = #tpu.dot_dimension_numbers<[1], [0], [0], [1], [0, 0, 1, 1], [], []>} : vector<16x64xbf16>, vector<64x64xbf16>, vector<16x64xf32> -> vector<16x64xf32>
    %30 = arith.addf %24, %29 : vector<16x64xf32>
    %c0_26 = arith.constant 0 : index
    %c0_27 = arith.constant 0 : index
    %31 = vector.load %arg5[%c0_26, %c0_27] : memref<1x64xf32, #tpu.memory_space<vmem>>, vector<1x64xf32>
    %32 = vector.broadcast %31 : vector<1x64xf32> to vector<16x64xf32>
    %33 = arith.addf %30, %32 : vector<16x64xf32>
    %cst_28 = arith.constant 0.000000e+00 : f32
    %34 = vector.broadcast %cst_28 : f32 to vector<16x64xf32>
    %35 = arith.maximumf %33, %34 : vector<16x64xf32>
    %36 = arith.truncf %35 : vector<16x64xf32> to vector<16x64xbf16>
    %c0_29 = arith.constant 0 : index
    %c0_30 = arith.constant 0 : index
    %37 = vector.load %arg6[%c0_29, %c0_30] : memref<64x256xbf16, #tpu.memory_space<vmem>>, vector<64x256xbf16>
    %cst_31 = arith.constant dense<0.000000e+00> : vector<16x256xf32>
    %38 = tpu.matmul %36, %37, %cst_31 {dimension_numbers = #tpu.dot_dimension_numbers<[1], [0], [0], [1], [0, 0, 1, 1], [], []>} : vector<16x64xbf16>, vector<64x256xbf16>, vector<16x256xf32> -> vector<16x256xf32>
    %c0_32 = arith.constant 0 : index
    %c0_33 = arith.constant 0 : index
    %39 = vector.load %arg7[%c0_32, %c0_33] : memref<1x256xf32, #tpu.memory_space<vmem>>, vector<1x256xf32>
    %40 = vector.broadcast %39 : vector<1x256xf32> to vector<16x256xf32>
    %41 = arith.addf %38, %40 : vector<16x256xf32>
    %c0_34 = arith.constant 0 : index
    %c0_35 = arith.constant 0 : index
    %42 = vector.load %arg8[%c0_34, %c0_35] : memref<64x256xf32, #tpu.memory_space<vmem>>, vector<64x256xf32>
    %cst_36 = arith.constant dense<0.000000e+00> : vector<16x256xf32>
    %43 = tpu.matmul %1, %42, %cst_36 {dimension_numbers = #tpu.dot_dimension_numbers<[1], [0], [0], [1], [0, 0, 1, 1], [], []>} : vector<16x64xf32>, vector<64x256xf32>, vector<16x256xf32> -> vector<16x256xf32>
    %44 = arith.addf %41, %43 : vector<16x256xf32>
    %c0_37 = arith.constant 0 : index
    %c0_38 = arith.constant 0 : index
    %c0_39 = arith.constant 0 : index
    %45 = vector.load %arg9[%c0_37, %c0_38, %c0_39] : memref<1x16x256xf32, #tpu.memory_space<vmem>>, vector<1x16x256xf32>
    %46 = vector.shape_cast %45 : vector<1x16x256xf32> to vector<16x256xf32>
    %47 = vector.shape_cast %44 : vector<16x256xf32> to vector<1x16x256xf32>
    tpu.vector_store %arg9[%c0_37, %c0_38, %c0_39], %47 {strides = array<i32>} : memref<1x16x256xf32, #tpu.memory_space<vmem>>, vector<1x16x256xf32>,
    return
  }
  func.func @transform_0(%arg0: i32) -> (i32, i32, i32) {
    %c0_i32 = arith.constant 0 : i32
    %c0_i32_0 = arith.constant 0 : i32
    %c0_i32_1 = arith.constant 0 : i32
    return %arg0, %c0_i32, %c0_i32_0 : i32, i32, i32
  }
  func.func @transform_1(%arg0: i32) -> (i32, i32) {
    %c0_i32 = arith.constant 0 : i32
    %c0_i32_0 = arith.constant 0 : i32
    %c0_i32_1 = arith.constant 0 : i32
    return %c0_i32, %c0_i32_0 : i32, i32
  }
  func.func @transform_2(%arg0: i32) -> (i32, i32) {
    %c0_i32 = arith.constant 0 : i32
    %c0_i32_0 = arith.constant 0 : i32
    %c0_i32_1 = arith.constant 0 : i32
    return %c0_i32, %c0_i32_0 : i32, i32
  }
  func.func @transform_3(%arg0: i32) -> (i32, i32, i32) {
    %c0_i32 = arith.constant 0 : i32
    %c0_i32_0 = arith.constant 0 : i32
    %c0_i32_1 = arith.constant 0 : i32
    %c0_i32_2 = arith.constant 0 : i32
    return %c0_i32, %c0_i32_0, %c0_i32_1 : i32, i32, i32
  }
  func.func @transform_4(%arg0: i32) -> (i32, i32) {
    %c0_i32 = arith.constant 0 : i32
    %c0_i32_0 = arith.constant 0 : i32
    %c0_i32_1 = arith.constant 0 : i32
    return %c0_i32, %c0_i32_0 : i32, i32
  }
  func.func @transform_5(%arg0: i32) -> (i32, i32) {
    %c0_i32 = arith.constant 0 : i32
    %c0_i32_0 = arith.constant 0 : i32
    %c0_i32_1 = arith.constant 0 : i32
    return %c0_i32, %c0_i32_0 : i32, i32
  }
  func.func @transform_6(%arg0: i32) -> (i32, i32) {
    %c0_i32 = arith.constant 0 : i32
    %c0_i32_0 = arith.constant 0 : i32
    %c0_i32_1 = arith.constant 0 : i32
    return %c0_i32, %c0_i32_0 : i32, i32
  }
  func.func @transform_7(%arg0: i32) -> (i32, i32) {
    %c0_i32 = arith.constant 0 : i32
    %c0_i32_0 = arith.constant 0 : i32
    %c0_i32_1 = arith.constant 0 : i32
    return %c0_i32, %c0_i32_0 : i32, i32
  }
  func.func @transform_8(%arg0: i32) -> (i32, i32, i32) {
    %c0_i32 = arith.constant 0 : i32
    %c0_i32_0 = arith.constant 0 : i32
    %c0_i32_1 = arith.constant 0 : i32
    return %arg0, %c0_i32, %c0_i32_0 : i32, i32, i32
  }
}

</mosaic_0001>

<bundles_post_ra>
// kernel: tpu_custom_call.1
= control target key start
LH: loop header
LB: loop body
LE: loop exit
PB: predicated region body
PF: predicated region fallthrough
CT: control target
= control target key end

     0   :  { %s1863_s0 = inlined_call_operand.hbm [shape: f32[2,16,64], index: 0, kind: input, shape index: {}]   ;;  %s1864_s1 = inlined_call_operand.hbm [shape: bf16[64,64], index: 1, kind: input, shape index: {}]   ;;  %s1865_s2 = inlined_call_operand.vmem [shape: f32[1,64], index: 2, kind: input, shape index: {}]   ;;  %s1866_s3 = inlined_call_operand.hbm [shape: bf16[3,64,64], index: 3, kind: input, shape index: {}]   ;;  %s1867_s4 = inlined_call_operand.vmem [shape: f32[1,64], index: 4, kind: input, shape index: {}]   ;;  %s1868_s5 = inlined_call_operand.hbm [shape: bf16[64,256], index: 5, kind: input, shape index: {}]   ;;  %s1869_s6 = inlined_call_operand.vmem [shape: f32[1,256], index: 6, kind: input, shape index: {}]   ;;  %s1870_s7 = inlined_call_operand.hbm [shape: f32[64,256], index: 7, kind: input, shape index: {}]   ;;  %s1871_s8 = inlined_call_operand.hbm [shape: f32[2,16,256], index: 8, kind: output, shape index: {}]  }
   0x1   :  { %1878 = sst [smem:[#allocation17_spill]] %s1864_s1 }
   0x2   :  { %1879 = sst [smem:[#allocation18_spill]] %s1866_s3 }
   0x3   :  { %13 = vsyncpa [#allocation4], 0 }
   0x4   :  { %15 = vsyncpa [#allocation4 + $0x1], 0 }
   0x5   :  { %16 = vsyncpa [#allocation7], 0 }
   0x6   :  { %17 = vsyncpa [#allocation10], 0 }
   0x7   :  { %18 = vsyncpa [#allocation5], 0 }
   0x8   :  { %20 = vsyncpa [#allocation5 + $0x1], 0  ;;  %s1586_s27 = smov 0   ;;  %s1588_s28 = smov 0  }
   0x9   :  { %s1590_s29 = smov 0   ;;  %s1592_s30 = smov 0  }
   0xa LB: > { %s1607_s9 = sadd.s32 4294967295, %s1522_s30   ;;  %s1067_s10 = sadd.s32 4294967294, %s1522_s30   ;;  %s1522_s30 = sphi %s1592_s30, %s1903_s30   ;;  %s1518_s29 = sphi %s1590_s29, %s1902_s29   ;;  %s1514_s28 = sphi %s1588_s28, %s1901_s28   ;;  %s1510_s27 = sphi %s1586_s27, %s1900_s27  }
   0xb   : > { %p46_p0 = scmp.ne.s32.totalorder %s1514_s28, %s1510_s27  ;;  %p1872_p1 = scmp.eq.s32.totalorder %s1607_s9, 0 }
   0xc   : > { %p223_p3 = scmp.eq.s32.totalorder %s1067_s10, 1  ;;  %p1068_p5 = scmp.ge.s32.totalorder %s1522_s30, 1 }
   0xd   : > { %p1616_p4 = por %p1872_p1, %p46_p0  ;;  %p230_p7 = scmp.lt.s32.totalorder %s1522_s30, 3 }
   0xe   : > { %p1621_p6 = por %p223_p3, %p46_p0  ;;  %s1524_s14 = smov [#allocation6]  }
   0xf   : > { %s1880_s11 = scalar_select %p1616_p4, 1, 0 }
  0x10   : > { %s1881_s12 = scalar_select %p1621_p6, 1, 0 }
  0x11   : > { %p1626_p8 = pnand %p1068_p5, %p230_p7  ;;  %s242_s15 = sshll.u32 %s1524_s14, 4  ;;  %s243_s15 = int_to_ptr.vmem [resolvable:$true] %s242_s15 }
  0x12   : > { %s1525_s17 = smov [#allocation9]   ;;  %s1329_s19 = scalar_lea.vmem %s243_s15, 512 }
  0x13   : > { %s1882_s13 = scalar_select %p1626_p8, 1, 0 }
  0x14   : > { %p1212_p9 = pneg %p1626_p8  ;;  %s274_s18 = sshll.u32 %s1525_s17, 4  ;;  %s275_s18 = int_to_ptr.vmem [resolvable:$true] %s274_s18 }
  0x15   : > { %p1330_p13 = scmp.ne.s32.totalorder %s243_s15, %s1329_s19  ;;  %p1337_p5 = scmp.lt.s32.totalorder %s243_s15, %s243_s15 }
  0x16   : > { %p1635_p11 = pnand %p1212_p9, %p1872_p1  ;;  %p1338_p7 = scmp.lt.s32.totalorder %s1329_s19, %s1329_s19 }
  0x18   : > { %p1320_p12 = pneg %p1635_p11  ;;  %p1339_p10 = por %p1338_p7, %p1337_p5 }
  0x1a   : > { %p1332_p0 = pnand %p1330_p13, %p1320_p12 }
  0x1c   : > { %p1333_p3 = pneg %p1332_p0 }
  0x1e   : > { %p1340_p9 = pnand %p1339_p10, %p1333_p3 }
  0x20   : > { %1343 = shalt.err (!%p1340_p9)
}
  0x21   : > { %s1526_s20 = smov 64   ;;  %s1527_s21 = smov 4  }
  0x22   : > { %s1884_s1 = sld [smem:[#allocation17_spill]]  ;;  %s1355_s24 = scalar_lea.vmem %s275_s18, 1024 }
  0x23   : > { %p1356_p13 = scmp.ne.s32.totalorder %s275_s18, %s1355_s24  ;;  %p1363_p10 = scmp.lt.s32.totalorder %s275_s18, %s275_s18 }
  0x24   : > { %p1364_p3 = scmp.lt.s32.totalorder %s1355_s24, %s1355_s24 }
  0x25   : > { %p1358_p0 = pnand %p1356_p13, %p1320_p12 }
  0x26   : > { %p1365_p7 = por %p1364_p3, %p1363_p10 }
  0x27   : > { %p1359_p5 = pneg %p1358_p0 }
  0x28   : > { %1215 = dma.hbm_to_vmem [thread:$0]  (!%p1635_p11), %s1884_s1, 512, %s243_s15, [#allocation7], %s1526_s20, %s1526_s20, %s1527_s21  }
  0x29   : > { %p1366_p9 = pnand %p1365_p7, %p1359_p5 }
  0x2b   : > { %1369 = shalt.err (!%p1366_p9)
}
  0x2c   : > { %s1873_s25 = smov 128   ;;  %s1874_s26 = smov 8  }
  0x2d   : > { %1221 = dma.hbm_to_vmem [thread:$0]  (!%p1635_p11), %s1868_s5, 1024, %s275_s18, [#allocation10], %s1873_s25, %s1873_s25, %s1874_s26  }
  0x2e   : > { %s1530_s15 = smov [#allocation8]   ;;  %s1531_s19 = smov [#allocation11]  }
  0x2f   : > { %s258_s17 = sshll.u32 %s1530_s15, 4  ;;  %s290_s22 = sshll.u32 %s1531_s19, 4  ;;  %s259_s17 = int_to_ptr.vmem [resolvable:$true] %s258_s17  ;;  %s291_s22 = int_to_ptr.vmem [resolvable:$true] %s290_s22 }
  0x30   : > { %s1381_s23 = scalar_lea.vmem %s259_s17, 1536  ;;  %p1389_p10 = scmp.lt.s32.totalorder %s259_s17, %s259_s17 }
  0x31   : > { %p1382_p13 = scmp.ne.s32.totalorder %s259_s17, %s1381_s23  ;;  %p1390_p3 = scmp.lt.s32.totalorder %s1381_s23, %s1381_s23 }
  0x33   : > { %p1384_p0 = pnand %p1382_p13, %p1320_p12  ;;  %p1391_p7 = por %p1390_p3, %p1389_p10 }
  0x35   : > { %p1385_p5 = pneg %p1384_p0 }
  0x37   : > { %p1392_p9 = pnand %p1391_p7, %p1385_p5 }
  0x39   : > { %1395 = shalt.err (!%p1392_p9)
}
  0x3a   : > { %s1885_s3 = sld [smem:[#allocation18_spill]]  ;;  %s1407_s10 = scalar_lea.vmem %s291_s22, 2048 }
  0x3b   : > { %p1408_p1 = scmp.ne.s32.totalorder %s291_s22, %s1407_s10  ;;  %p1415_p2 = scmp.lt.s32.totalorder %s291_s22, %s291_s22 }
  0x3c   : > { %p1416_p10 = scmp.lt.s32.totalorder %s1407_s10, %s1407_s10 }
  0x3d   : > { %p1410_p13 = pnand %p1408_p1, %p1320_p12 }
  0x3e   : > { %p1417_p5 = por %p1416_p10, %p1415_p2 }
  0x3f   : > { %p1411_p0 = pneg %p1410_p13 }
  0x40   : > { %1218 = dma.hbm_to_vmem [thread:$0]  (!%p1635_p11), %s1885_s3, 1536, %s259_s17, [#allocation7], %s1526_s20, %s1526_s20, %s1527_s21  }
  0x41   : > { %p1418_p3 = pnand %p1417_p5, %p1411_p0 }
  0x43   : > { %1421 = shalt.err (!%p1418_p3)
}
  0x44   : > { %s1532_s14 = smov 256   ;;  %s1533_s20 = smov 16  }
  0x45   : > { %1224 = dma.hbm_to_vmem [thread:$0]  (!%p1635_p11), %s1870_s7, 2048, %s291_s22, [#allocation10], %s1532_s14, %s1532_s14, %s1533_s20  }
  0x46   : > { %s1683_s17 = sadd.s32 1, %s1522_s30   ;;  %s33_s23 = sadd.s32 1, %s1518_s29 }
  0x47   : > { %s30_s19 = ssub.s32 %s1522_s30, %s1683_s17  ;;  %p40_p2 = scmp.ne.s32.totalorder %s1518_s29, %s1514_s28 }
  0x48   : > { %p31_p1 = scmp.eq.s32.totalorder %s30_s19, 0  ;;  %p41_p12 = scmp.eq.s32.totalorder %s1522_s30, 0 }
  0x49   : > { %p1886_p9 = scmp.eq.s32.totalorder %s1607_s9, 1  ;;  %p1237_p0 = scmp.lt.s32.totalorder %s1522_s30, 2 }
  0x4a   : > { %s1692_s18 = scalar_select %p31_p1, %s1518_s29, %s33_s23  }
  0x4b   : > { %p42_p7 = por %p41_p12, %p40_p2  ;;  %p1696_p13 = por %p1886_p9, %p40_p2 }
  0x4c   : > { %s304_s16 = sand.u32 1, %s1518_s29   ;;  %s1122_s22 = sshll.u32 %s1522_s30, 8 }
  0x4d   : > { %s1887_s24 = scalar_select %p1696_p13, 1, 0 }
  0x4e   : > { %s1074_s10 = sshll.u32 %s304_s16, 4  ;;  %s1706_s21 = scalar_lea.hbm %s1863_s0, %s1122_s22 }
  0x4f   : > { %s308_s15 = scalar_lea.vmem [#allocation3], %s1074_s10  ;;  %p1710_p11 = pnand %p1237_p0, %p42_p7 }
  0x50   : > { %s315_s19 = sshll.u32 %s308_s15, 4  ;;  %s1714_s25 = scalar_lea.sflag [#allocation4], %s304_s16  ;;  %s1708_s19 = int_to_ptr.vmem [resolvable:$true] %s315_s19 }
  0x51   : > { %s1422_s26 = scalar_lea.hbm %s1706_s21, 256  ;;  %p1424_p5 = pneg %p1710_p11 }
  0x52   : > { %p1423_p10 = scmp.ne.s32.totalorder %s1706_s21, %s1422_s26  ;;  %s1427_s10 = scalar_lea.hbm %s1863_s0, 512 }
  0x53   : > { %p1428_p2 = scmp.lt.s32.totalorder %s1706_s21, %s1863_s0  ;;  %p1429_p12 = scmp.lt.s32.totalorder %s1427_s10, %s1422_s26 }
  0x54   : > { %p1425_p3 = pnand %p1424_p5, %p1423_p10 }
  0x55   : > { %p1430_p7 = por %p1429_p12, %p1428_p2 }
  0x56   : > { %p1426_p1 = pneg %p1425_p3 }
  0x58   : > { %p1431_p9 = pnand %p1430_p7, %p1426_p1 }
  0x5a   : > { %1434 = shalt.err (!%p1431_p9)
}
  0x5b   : > { %s1435_s16 = scalar_lea.vmem %s1708_s19, 256  ;;  %s1534_s1 = smov [#allocation3]  }
  0x5c   : > { %p1436_p0 = scmp.ne.s32.totalorder %s1708_s19, %s1435_s16  ;;  %s1440_s3 = sshll.u32 %s1534_s1, 4  ;;  %s1441_s3 = int_to_ptr.vmem [resolvable:$false] %s1440_s3 }
  0x5d   : > { %s1442_s22 = scalar_lea.vmem %s1441_s3, 512  ;;  %p1443_p3 = scmp.lt.s32.totalorder %s1708_s19, %s1441_s3 }
  0x5e   : > { %p1438_p6 = pnand %p1436_p0, %p1424_p5  ;;  %p1444_p13 = scmp.lt.s32.totalorder %s1442_s22, %s1435_s16 }
  0x60   : > { %p1439_p10 = pneg %p1438_p6  ;;  %p1445_p4 = por %p1444_p13, %p1443_p3 }
  0x62   : > { %p1446_p8 = pnand %p1445_p4, %p1439_p10 }
  0x64   : > { %1449 = shalt.err (!%p1446_p8)
}
  0x65   : > { %s1889_s26 = smov 8   ;;  %s1890_s14 = smov 128  }
  0x66   : > { %1228 = dma.hbm_to_vmem [thread:$0]  (!%p1710_p11), %s1706_s21, 256, %s1708_s19, %s1714_s25, %s1890_s14, %s1890_s14, %s1889_s26  }
  0x67   : > { %p1891_p6 = scmp.ne.s32.totalorder %s1882_s13, 0 }
  0x68   : > { %s1741_s1 = sand.u32 (!%p1891_p6), 1, %s1514_s28   ;;  %p1892_p4 = scmp.ne.s32.totalorder (!%p1891_p6), %s1880_s11, 0 }
  0x69   : > { %327 = sbr.rel (%p1891_p6) target bundleno = 784 (0x310), region = 52  ;;  %s1078_s3 = sshll.u32 (!%p1891_p6), %s1741_s1, 4 }
  0x6a   : > { %s330_s10 = scalar_lea.sflag (!%p1891_p6), [#allocation4], %s1741_s1  ;;  %s333_s20 = scalar_lea.vmem (!%p1891_p6), [#allocation3], %s1078_s3 }
  0x6e   : > { %1493 = dma.done.wait (%p1892_p4), %s330_s10, 256  }
  0x6f   : > { %1495 = vsyncadd (%p1892_p4), %s330_s10, 4294967040  ;;  %p1893_p8 = scmp.eq.s32.totalorder %s1607_s9, 0 }
  0x71   : > { %1497 = dma.done.wait (%p1893_p8), [#allocation7], 2048   ;;  %p1894_p13 = pmov %p1893_p8 }
  0x72   : > { %p1895_p11 = pmov %p1893_p8 }
  0x73   : > { %1499 = vsyncadd (%p1894_p13), [#allocation7], 4294965248 }
  0x74   : > { %1501 = dma.done.wait (%p1895_p11), [#allocation10], 3072   ;;  %p1896_p5 = pmov %p1893_p8 }
  0x75   : > { %vm386_vm0 = vcmask 523264   ;;  %v1535_v0 = vmov 0.0   ;;  %vm1536_vm1 = vmmov 0   ;;  %v1290_v1 = vld [vmem:[#allocation6 + $0x18] sm:$0xff]   ;;  %v1291_v2 = vld [vmem:[#allocation6 + $0x10] sm:$0xff]   ;;  %v1292_v3 = vld [vmem:[#allocation6 + $0x8] sm:$0xff]  }
  0x76   : > { %1503 = vsyncadd (%p1896_p5), [#allocation10], 4294964224  ;;  %1144 = vmatprep.subr.bf16.mxu0 %v1535_v0  ;;  %1152 = vmatprep.mubr.msk.bf16.mxu0 %vm1536_vm1, %v1535_v0  ;;  %387 = vst.msk [vmem:[#allocation2] sm:$0xff] %vm386_vm0, %v1535_v0  ;;  %v1293_v4 = vld [vmem:[#allocation6] sm:$0xff]   ;;  %v1771_v6 = vld [vmem:[%s333_s20 + $0x8] sm:$0xff]  ;;  %v1537_v62 = vmov 0  }
  0x77   : > { %388 = vst.msk [vmem:[#allocation2 + $0x18] sm:$0xff] %vm386_vm0, %v1535_v0  ;;  %1156 = vmatprep.subr.bf16.mxu1 %v1535_v0  ;;  %1164 = vmatprep.mubr.msk.bf16.mxu1 %vm1536_vm1, %v1535_v0  ;;  %v1769_v5 = vld [vmem:[%s333_s20] sm:$0xff]  ;;  %v1294_v8 = vld [vmem:[#allocation8 + $0x18] sm:$0xff]   ;;  %v1298_v12 = vld [vmem:[#allocation8 + $0x8] sm:$0xff]   ;;  %s1083_s15 = sshll.u32 %s1741_s1, 5  ;;  %s1123_s26 = sshll.u32 %s1607_s9, 9 }
  0x78   : > { %1145 = vmatpush3.bf16.msra.mxu0 %v1290_v1  ;;  %v385_v7 = vpack.c.bf16 %v1771_v6, %v1769_v5  ;;  %v1295_v9 = vld [vmem:[#allocation8 + $0x38] sm:$0xff]   ;;  %1157 = vmatpush3.bf16.msra.mxu1 %v1294_v8  ;;  %v1296_v10 = vld [vmem:[#allocation8 + $0x10] sm:$0xff]   ;;  %v1299_v13 = vld [vmem:[#allocation8 + $0x28] sm:$0xff]   ;;  %s381_s16 = scalar_lea.vmem [#allocation12], %s1083_s15  ;;  %s1820_s10 = scalar_lea.hbm %s1871_s8, %s1123_s26 }
  0x79   : > { %1146 = vmatprep.subr.bf16.mxu0 %v1535_v0  ;;  %1158 = vmatprep.subr.bf16.mxu1 %v1535_v0  ;;  %v1297_v11 = vld [vmem:[#allocation8 + $0x30] sm:$0xff]   ;;  %v1300_v14 = vld [vmem:[#allocation8] sm:$0xff]   ;;  %v1302_v26 = vld [vmem:[#allocation8 + $0x58] sm:$0xff]   ;;  %s956_s22 = sshll.u32 %s381_s16, 4  ;;  %s943_s20 = scalar_lea.sflag [#allocation5], %s1741_s1  ;;  %s1815_s22 = int_to_ptr.vmem [resolvable:$true] %s956_s22 }
  0x7a   : > { %v1301_v15 = vld [vmem:[#allocation8 + $0x20] sm:$0xff]   ;;  %v1303_v32 = vld [vmem:[#allocation8 + $0x50] sm:$0xff]   ;;  %v1304_v33 = vld [vmem:[#allocation8 + $0x48] sm:$0xff]   ;;  %s1450_s9 = scalar_lea.vmem %s1815_s22, 512  ;;  %p1897_p2 = scmp.ne.s32.totalorder %s1887_s24, 0 }
  0x7b   : > { %v1084_v16 = vld [vmem:[%s1865_s2] ss:$0 sm:$0xff]  ;;  %v1306_v38 = vld [vmem:[#allocation9 + $0x30] ss:$8 sps:$4 sm:$0xff]   ;;  %v1308_v39 = vld [vmem:[#allocation9 + $0x34] ss:$8 sps:$4 sm:$0xff]   ;;  %p1451_p1 = scmp.ne.s32.totalorder %s1815_s22, %s1450_s9 }
  0x7c   : > { %1147 = vmatpush3.bf16.msra.mxu0 %v1291_v2  ;;  %1159 = vmatpush3.bf16.msra.mxu1 %v1296_v10  ;;  %v1305_v34 = vld [vmem:[#allocation8 + $0x40] sm:$0xff]   ;;  %v850_v40 = vld [vmem:[#allocation11 + $0x78] sm:$0xff]  ;;  %v849_v41 = vld [vmem:[#allocation11 + $0x70] sm:$0xff]  ;;  %s1538_s11 = smov [#allocation12]  }
  0x7d   : > { %1148 = vmatprep.subr.bf16.mxu0 %v1535_v0  ;;  %1160 = vmatprep.subr.bf16.mxu1 %v1535_v0  ;;  %v848_v42 = vld [vmem:[#allocation11 + $0x68] sm:$0xff]  ;;  %v847_v43 = vld [vmem:[#allocation11 + $0x60] sm:$0xff]  ;;  %v846_v46 = vld [vmem:[#allocation11 + $0x58] sm:$0xff]  ;;  %p1452_p12 = pnand %p1451_p1, %p1897_p2  ;;  %s1454_s13 = sshll.u32 %s1538_s11, 4  ;;  %s1455_s13 = int_to_ptr.vmem [resolvable:$false] %s1454_s13 }
  0x7e   : > { %v1311_v44 = vld [vmem:[#allocation9 + $0x24] ss:$8 sps:$4 sm:$0xff]   ;;  %v1309_v45 = vld [vmem:[#allocation9 + $0x20] ss:$8 sps:$4 sm:$0xff]   ;;  %v845_v47 = vld [vmem:[#allocation11 + $0x50] sm:$0xff]  ;;  %s1456_s25 = scalar_lea.vmem %s1455_s13, 1024  ;;  %p1457_p9 = scmp.lt.s32.totalorder %s1815_s22, %s1455_s13 }
  0x7f   : > { %v844_v48 = vld [vmem:[#allocation11 + $0x48] sm:$0xff]  ;;  %v843_v49 = vld [vmem:[#allocation11 + $0x40] sm:$0xff]  ;;  %v1314_v50 = vld [vmem:[#allocation9 + $0x14] ss:$8 sps:$4 sm:$0xff]   ;;  %p1453_p7 = pneg %p1452_p12  ;;  %p1458_p0 = scmp.lt.s32.totalorder %s1456_s25, %s1450_s9 }
  0x80   : > { %1149 = vmatpush3.bf16.msra.mxu0 %v1292_v3  ;;  %1161 = vmatpush3.bf16.msra.mxu1 %v1298_v12  ;;  %v1312_v51 = vld [vmem:[#allocation9 + $0x10] ss:$8 sps:$4 sm:$0xff]   ;;  %v840_v54 = vld [vmem:[#allocation11 + $0x28] sm:$0xff]  ;;  %v839_v55 = vld [vmem:[#allocation11 + $0x20] sm:$0xff] }
  0x81   : > { %1150 = vmatprep.subr.bf16.mxu0 %v1535_v0  ;;  %1162 = vmatprep.subr.bf16.mxu1 %v1535_v0  ;;  %v842_v52 = vld [vmem:[#allocation11 + $0x38] sm:$0xff]  ;;  %v841_v53 = vld [vmem:[#allocation11 + $0x30] sm:$0xff]  ;;  %v1317_v56 = vld [vmem:[#allocation9 + $0x4] ss:$8 sps:$4 sm:$0xff]   ;;  %p1459_p10 = por %p1458_p0, %p1457_p9 }
  0x82   : > { %v1315_v57 = vld [vmem:[#allocation9] ss:$8 sps:$4 sm:$0xff]   ;;  %v838_v58 = vld [vmem:[#allocation11 + $0x18] sm:$0xff]  ;;  %v837_v59 = vld [vmem:[#allocation11 + $0x10] sm:$0xff] }
  0x83   : > { %v836_v60 = vld [vmem:[#allocation11 + $0x8] sm:$0xff]  ;;  %v835_v61 = vld [vmem:[#allocation11] sm:$0xff]  ;;  %p1460_p3 = pnand %p1459_p10, %p1453_p7 }
  0x84   : > { %1151 = vmatpush3.bf16.msra.mxu0 %v1293_v4  ;;  %1163 = vmatpush3.bf16.msra.mxu1 %v1300_v14 }
  0x85   : > { %1168 = vmatprep.subr.bf16.mxu0 %v1535_v0  ;;  %1180 = vmatprep.subr.bf16.mxu1 %v1535_v0 }
  0x87   : > { %1153 = vmatmul.mubr.msk.bf16.vlgmr.msra.gmra.mxu0 %vm386_vm0, %v385_v7 }
  0x88   : > { %1176 = vmatprep.mubr.msk.bf16.mxu0 %vm1536_vm1, %v1535_v0  ;;  %1169 = vmatpush3.bf16.msra.mxu0 %v1295_v9 }
  0x89   : > { %1170 = vmatprep.subr.bf16.mxu0 %v1535_v0 }
  0x8c   : > { %1171 = vmatpush3.bf16.msra.mxu0 %v1297_v11 }
  0x8d   : > { %1172 = vmatprep.subr.bf16.mxu0 %v1535_v0 }
  0x90   : > { %1173 = vmatpush3.bf16.msra.mxu0 %v1299_v13 }
  0x91   : > { %1174 = vmatprep.subr.bf16.mxu0 %v1535_v0 }
  0x94   : > { %1175 = vmatpush3.bf16.msra.mxu0 %v1301_v15 }
  0x95   : > { %800 = vmatprep.subr.bf16.mxu0 %v1308_v39 }
 0x147   : > { %v465_v17 = vpop.f32.mrf.mxu0 }
 0x148   : > { %v466_v18 = vadd.f32 %v1084_v16, %v465_v17 }
 0x149   : > { %v1154_v19 = vpop.f32.mrf.mxu0 }
 0x14a   : > { %v472_v20 = vmax.f32 %v466_v18, 0.0 }
 0x14b   : > { %v468_v21 = vpop.f32.mrf.mxu0 }
 0x14c   : > { %474 = vst.msk [vmem:[#allocation2 + $0x8] sm:$0xff] %vm386_vm0, %v472_v20  ;;  %v469_v22 = vadd.f32 %v1084_v16, %v468_v21  ;;  %v739_v21 = vlaneseq }
 0x14d   : > { %v1155_v23 = vpop.f32.mrf.mxu0 }
 0x14e   : > { %v473_v24 = vmax.f32 %v469_v22, 0.0  ;;  %v740_v22 = vshrl.u32 %v739_v21, 7 }
 0x150   : > { %475 = vst.msk [vmem:[#allocation2 + $0x10] sm:$0xff] %vm386_vm0, %v473_v24  ;;  %v741_v23 = vsub.s32 0, %v740_v22  ;;  %v737_v24 = vld [vmem:[%s1869_s6] sm:$0x3] }
 0x153   : > { %v488_v25 = vld [vmem:[#allocation2 + $0x7] sm:$0xff] }
 0x154   : > { %v476_v28 = vld [vmem:[#allocation2 + $0x8] sm:$0xff] }
 0x157   : > { %v489_v27 = vld [vmem:[#allocation2 + $0xf] sm:$0xff] }
 0x158   : > { %v477_v29 = vld [vmem:[#allocation2 + $0x10] sm:$0xff]  ;;  %v490_v30 = vpack.c.bf16 %v489_v27, %v488_v25  ;;  %v745_v25 = vsub.s32 1, %v740_v22  ;;  %v742_v27 = vrot.slane %v737_v24, %v741_v23 }
 0x159   : > { %v478_v31 = vpack.c.bf16 %v477_v29, %v476_v28  ;;  %v635_v35 = vld [vmem:[#allocation2 + $0x9] sm:$0xff]  ;;  %v636_v36 = vld [vmem:[#allocation2 + $0x11] sm:$0xff] }
 0x15a   : > { %1165 = vmatmul.mubr.msk.bf16.vlgmr.msra.gmra.mxu1 %vm386_vm0, %v490_v30  ;;  %v637_v37 = vpack.c.bf16 %v636_v36, %v635_v35  ;;  %v746_v28 = vrot.slane %v737_v24, %v745_v25 }
 0x15b   : > { %1177 = vmatmul.mubr.msk.bf16.vlgmr.msra.gmra.mxu0 %vm386_vm0, %v478_v31  ;;  %1181 = vmatpush3.bf16.msra.mxu1 %v1302_v26 }
 0x15c   : > { %1188 = vmatprep.mubr.msk.bf16.mxu1 %vm1536_vm1, %v1535_v0  ;;  %1182 = vmatprep.subr.bf16.mxu1 %v1535_v0 }
 0x15d   : > { %801 = vmatpush1.bf16.msra.mxu0 %v1306_v38  ;;  %824 = vmatprep.mubr.bf16.mxu0 %v1537_v62 }
 0x15e   : > { %802 = vmatprep.subr.bf16.mxu0 %v1311_v44 }
 0x15f   : > { %1183 = vmatpush3.bf16.msra.mxu1 %v1303_v32 }
 0x160   : > { %1184 = vmatprep.subr.bf16.mxu1 %v1535_v0 }
 0x161   : > { %803 = vmatpush1.bf16.msra.mxu0 %v1309_v45 }
 0x162   : > { %804 = vmatprep.subr.bf16.mxu0 %v1314_v50 }
 0x163   : > { %1185 = vmatpush3.bf16.msra.mxu1 %v1304_v33 }
 0x164   : > { %1186 = vmatprep.subr.bf16.mxu1 %v1535_v0 }
 0x165   : > { %805 = vmatpush1.bf16.msra.mxu0 %v1312_v51 }
 0x166   : > { %806 = vmatprep.subr.bf16.mxu0 %v1317_v56 }
 0x167   : > { %1187 = vmatpush3.bf16.msra.mxu1 %v1305_v34 }
 0x168   : > { %873 = vmatprep.subr.mxu1 %v850_v40 }
 0x169   : > { %807 = vmatpush1.bf16.msra.mxu0 %v1315_v57 }
 0x16a   : > { %1189 = vmatmul.mubr.msk.bf16.vlgmr.msra.gmra.mxu1 %vm386_vm0, %v637_v37 }
 0x16b   : > { %921 = vmatprep.mubr.f32.mxu1 %v1535_v0  ;;  %874 = vmatpush1.msra.mxu1 %v849_v41 }
 0x16c   : > { %875 = vmatprep.subr.mxu1 %v848_v42 }
 0x16d   : > { %876 = vmatpush1.msra.mxu1 %v847_v43 }
 0x16e   : > { %877 = vmatprep.subr.mxu1 %v846_v46 }
 0x16f   : > { %878 = vmatpush1.msra.mxu1 %v845_v47 }
 0x170   : > { %879 = vmatprep.subr.mxu1 %v844_v48 }
 0x171   : > { %880 = vmatpush1.msra.mxu1 %v843_v49 }
 0x172   : > { %881 = vmatprep.subr.mxu1 %v842_v52 }
 0x173   : > { %882 = vmatpush1.msra.mxu1 %v841_v53 }
 0x174   : > { %883 = vmatprep.subr.mxu1 %v840_v54 }
 0x175   : > { %884 = vmatpush1.msra.mxu1 %v839_v55 }
 0x176   : > { %885 = vmatprep.subr.mxu1 %v838_v58 }
 0x177   : > { %886 = vmatpush1.msra.mxu1 %v837_v59 }
 0x178   : > { %887 = vmatprep.subr.mxu1 %v836_v60 }
 0x179   : > { %888 = vmatpush1.msra.mxu1 %v835_v61 }
 0x17a   : > { %1115 = vmatmul.mubr.msk.f32.vlgmr.msra.gmra.mxu1 %vm386_vm0, %v1769_v5  ;;  %v1105_v5 = vld [vmem:[%s1867_s4] ss:$0 sm:$0xff] }
 0x17b   : > { %927 = vmatprep.mubr.f32.mxu1 %v1535_v0 }
 0x17e   : > { %1116 = vmatmul.mubr.msk.f32.gmra.mxu1 %vm386_vm0, %v1771_v6 }
 0x21a   : > { %v560_v63 = vpop.f32.mrf.mxu1 }
 0x21b   : > { %v628_v1 = vpop.f32.mrf.mxu0 }
 0x21c   : > { %v1166_v2 = vpop.f32.mrf.mxu1  ;;  %v629_v10 = vadd.f32 %v628_v1, %v560_v63 }
 0x21d   : > { %v1178_v3 = vpop.f32.mrf.mxu0 }
 0x21e   : > { %v563_v4 = vpop.f32.mrf.mxu1 }
 0x21f   : > { %v631_v7 = vpop.f32.mrf.mxu0 }
 0x220   : > { %v1167_v8 = vpop.f32.mrf.mxu1  ;;  %v632_v0 = vadd.f32 %v631_v7, %v563_v4 }
 0x221   : > { %v1179_v9 = vpop.f32.mrf.mxu0 }
 0x22a   : > { %v708_v11 = vpop.f32.mrf.mxu1 }
 0x22b   : > { %v715_v12 = vadd.f32 %v708_v11, %v629_v10 }
 0x22c   : > { %v1190_v13 = vpop.f32.mrf.mxu1 }
 0x22d   : > { %v724_v6 = vadd.f32 %v1105_v5, %v715_v12 }
 0x22e   : > { %v711_v14 = vpop.f32.mrf.mxu1 }
 0x22f   : > { %v716_v15 = vadd.f32 %v711_v14, %v632_v0  ;;  %v726_v18 = vmax.f32 %v724_v6, 0.0 }
 0x230   : > { %v1191_v16 = vpop.f32.mrf.mxu1 }
 0x231   : > { %v725_v17 = vadd.f32 %v1105_v5, %v716_v15 }
 0x233   : > { %v727_v19 = vmax.f32 %v725_v17, 0.0 }
 0x235   : > { %v728_v20 = vpack.c.bf16 %v727_v19, %v726_v18 }
 0x237   : > { %1114 = vmatmul.mubr.msk.bf16.vlgmr.msra.gmra.mxu0 %vm386_vm0, %v728_v20 }
 0x23a   : > { %v923_v26 = vpop.f32.mrf.mxu1 }
 0x23c   : > { %v925_v30 = vpop.f32.mrf.mxu1 }
 0x23e   : > { %v929_v36 = vpop.f32.mrf.mxu1 }
 0x240   : > { %v931_v42 = vpop.f32.mrf.mxu1 }
 0x2f7   : > { %v826_v29 = vpop.f32.mrf.mxu0 }
 0x2f8   : > { %v827_v31 = vadd.f32 %v826_v29, %v742_v27 }
 0x2f9   : > { %v828_v32 = vpop.f32.mrf.mxu0 }
 0x2fa   : > { %v934_v33 = vadd.f32 %v923_v26, %v827_v31  ;;  %v829_v34 = vadd.f32 %v828_v32, %v746_v28 }
 0x2fb   : > { %v830_v35 = vpop.f32.mrf.mxu0 }
 0x2fc   : > { %938 = vst [vmem:[%s381_s16] sm:$0xff] %v934_v33  ;;  %v935_v37 = vadd.f32 %v925_v30, %v829_v34  ;;  %v831_v38 = vadd.f32 %v830_v35, %v742_v27 }
 0x2fd   : > { %v832_v39 = vpop.f32.mrf.mxu0 }
 0x2fe   : > { %939 = vst [vmem:[%s381_s16 + $0x8] sm:$0xff] %v935_v37  ;;  %v936_v40 = vadd.f32 %v929_v36, %v831_v38  ;;  %v833_v41 = vadd.f32 %v832_v39, %v746_v28 }
 0x300   : > { %940 = vst [vmem:[%s381_s16 + $0x10] sm:$0xff] %v936_v40  ;;  %v937_v43 = vadd.f32 %v931_v42, %v833_v41 }
 0x302   : > { %941 = vst [vmem:[%s381_s16 + $0x18] sm:$0xff] %v937_v43 }
 0x303   : > { %1463 = shalt.err (!%p1460_p3)
}
 0x304   : > { %s1464_s21 = scalar_lea.hbm %s1820_s10, 512  ;;  %s1468_s15 = scalar_lea.hbm %s1871_s8, 1024 }
 0x305   : > { %p1465_p6 = scmp.ne.s32.totalorder %s1820_s10, %s1464_s21  ;;  %p1469_p13 = scmp.lt.s32.totalorder %s1820_s10, %s1871_s8 }
 0x306   : > { %p1470_p11 = scmp.lt.s32.totalorder %s1468_s15, %s1464_s21 }
 0x307   : > { %p1466_p4 = pnand %p1465_p6, %p1897_p2 }
 0x308   : > { %p1471_p5 = por %p1470_p11, %p1469_p13 }
 0x309   : > { %p1467_p8 = pneg %p1466_p4 }
 0x30b   : > { %p1472_p1 = pnand %p1471_p5, %p1467_p8 }
 0x30d   : > { %1475 = shalt.err (!%p1472_p1)
}
 0x30e   : > { %s1539_s14 = smov 256   ;;  %s1540_s3 = smov 16  }
 0x30f   : > { %1210 = dma.vmem_to_hbm [thread:$0]  (%p1897_p2), %s1815_s22, 512, %s1820_s10, %s943_s20, %s1539_s14, %s1539_s14, %s1540_s3  }
 0x310 PF: > { %s971_s9 = sand.u32 1, %s1510_s27   ;;  %p1898_p12 = scmp.ne.s32.totalorder %s1881_s12, 0 }
 0x311   : > { %p1899_p7 = scmp.ge.s32.totalorder %s1522_s30, 2  ;;  %s972_s11 = scalar_lea.sflag [#allocation5], %s971_s9 }
 0x313   : > { %p1230_p9 = pnand %p1899_p7, %p1898_p12 }
 0x315   : > { %p1231_p0 = pneg %p1230_p9 }
 0x317   : > { %1505 = dma.done.wait (%p1231_p0), %s972_s11, 512  }
 0x318   : > { %1507 = vsyncadd (%p1231_p0), %s972_s11, 4294966784  ;;  %p23_p10 = scmp.ge.s32.totalorder %s1683_s17, 4   ;;  %s1900_s27 = smov %s1514_s28 }
 0x319   : > { %s1901_s28 = smov %s1518_s29  ;;  %s1902_s29 = smov %s1692_s18 }
 0x31a   : > { %s1903_s30 = smov %s1683_s17  ;;  %25 = sbr.rel (!%p23_p10) target bundleno = 10 (0xa), region = 115 }
 0x31f   :  { %977 = vsyncpa [#allocation4], 1 }
 0x320   :  { %979 = vsyncpa [#allocation4 + $0x1], 1 }
 0x321   :  { %980 = vsyncpa [#allocation7], 1 }
 0x322   :  { %981 = vsyncpa [#allocation10], 1 }
 0x323   :  { %982 = vsyncpa [#allocation5], 1 }
 0x324   :  { %984 = vsyncpa [#allocation5 + $0x1], 1 }

</bundles_post_ra>
